<compile_context>
chip_gen: v7x
topology: tpu7x:2x2x1
jax: 0.10.0
libtpu: 0.0.40
codegen_flags: <defaults>
</compile_context>

<pallas_src>
import math
import numpy as np

import jax
import jax.numpy as jnp
from jax import lax
from jax.experimental import pallas as pl
from jax.experimental.pallas import tpu as pltpu


def _ceil_div(a, b):
    return -(-a // b)


# ----------------------------------------------------------------------------
# Pallas kernel factory: fused im2col + GEMM conv
#   weights-as-LHS, flattened-padded-spatial as lanes, contraction = ks*ks*Cin
# ----------------------------------------------------------------------------
def _make_conv_kernel(tap_offs, q_tile, pad_rows, has_bias):
    """tap_offs: static lane shifts dy*Wp+dx (dy-major, dx-minor), matching the
    (dy, dx, cin) column order of the rotated weight matrix."""

    def kernel(*refs):
        if has_bias:
            w_ref, b_ref, xa_ref, xb_ref, o_ref = refs
        else:
            w_ref, xa_ref, xb_ref, o_ref = refs
        # (Cin, 2*Q_TILE) window covering flattened-padded-image positions
        # [t*Q_TILE, (t+2)*Q_TILE); Q_TILE >= max(tap_offs) so every tap's
        # shifted chunk is a *static* in-window slice.
        window = jnp.concatenate([xa_ref[...], xb_ref[...]], axis=1)
        chunks = [window[:, off:off + q_tile] for off in tap_offs]
        if pad_rows:  # pad contraction dim to a multiple of 8 sublanes
            chunks.append(jnp.zeros((pad_rows, q_tile), window.dtype))
        slab = jnp.concatenate(chunks, axis=0)                 # (kkc_pad, Q_TILE)
        acc = jnp.dot(w_ref[...], slab,
                      preferred_element_type=jnp.float32)      # (CoutTot, Q_TILE)
        if has_bias:
            acc = acc + b_ref[...]
        o_ref[...] = acc.astype(o_ref.dtype)

    return kernel


# ----------------------------------------------------------------------------
# Tile / VMEM sizing (generation-safe: budget-based, not a fixed cap)
# ----------------------------------------------------------------------------
def _pick_q_tile(total_q, max_off, cin, cout_tot, kkc_pad, x_bytes, batch,
                 tile_budget_bytes=18 * 2**20, max_tile=4096):
    """Largest multiple-of-128 spatial tile whose VMEM footprint fits budget."""

    def footprint(qt):
        x_blocks = 2 * 2 * cin * qt * x_bytes            # 2 x specs, double-buffered
        o_blocks = 2 * cout_tot * qt * 4                 # f32 out, double-buffered
        w_blocks = 2 * (cout_tot * kkc_pad * x_bytes + cout_tot * 4)
        scratch = (2 * cin * qt + kkc_pad * qt) * x_bytes + cout_tot * qt * 4
        return x_blocks + o_blocks + w_blocks + scratch

    min_tile = max(128, 128 * _ceil_div(max_off, 128))   # must cover the conv halo
    cover = 128 * _ceil_div(total_q, 128)
    hi = min(max_tile, cover)
    if batch == 1 and cover >= 256:
        # keep >= 2 grid points so both v7x TensorCores get work when B == 1
        hi = min(hi, 128 * _ceil_div(_ceil_div(total_q, 2), 128))
    qt = min_tile
    while qt + 128 <= hi and footprint(qt + 128) <= tile_budget_bytes:
        qt += 128
    return qt, footprint(qt)


# ----------------------------------------------------------------------------
# Wrapper
# ----------------------------------------------------------------------------
def rot_dcf_forward(x, s_bases, rot_mtx_s, joint_coeff, bias,
                    kernel_size, Ntheta, stride=1, compute_dtype=jnp.float32):
    assert stride == 1, "stride > 1 not implemented"  # TODO(synk): strided conv
    B, Cin, H, W = x.shape
    K, Cout, Cin2 = joint_coeff.shape
    assert Cin2 == Cin
    ks = kernel_size
    assert ks % 2 == 1, "'same' padding derivation assumes odd kernel_size"
    P = ks * ks
    pad = (ks - 1) // 2
    cout_tot = Ntheta * Cout
    kkc = P * Cin
    kkc_pad = 8 * _ceil_div(kkc, 8)
    Hp, Wp = H + 2 * pad, W + 2 * pad

    # --- rotated weights: constant-fold bases @ rot^T, then ONE GEMM ---------
    bases2d = s_bases.reshape(P, K)                                    # (P, K)
    big_bases = jnp.einsum('pk,tqk->tpq', bases2d, rot_mtx_s,
                           precision=lax.Precision.HIGHEST)
    big_bases = big_bases.reshape(Ntheta * P, K)
    coeff2d = joint_coeff.reshape(K, Cout * Cin)
    rot_flat = jnp.matmul(big_bases, coeff2d,
                          precision=lax.Precision.HIGHEST)             # (Nt*P, Co*Ci)
    rot5 = rot_flat.reshape(Ntheta, ks, ks, Cout, Cin)
    # row o = theta*Cout + co, col = (dy*ks + dx)*Cin + c
    w2d = jnp.transpose(rot5, (0, 3, 1, 2, 4)).reshape(cout_tot, kkc)
    w2d = jnp.pad(w2d, ((0, 0), (0, kkc_pad - kkc))).astype(compute_dtype)

    has_bias = bias is not None
    if has_bias:
        b2d = jnp.tile(bias, Ntheta).reshape(cout_tot, 1).astype(jnp.float32)

    # --- flattened padded x: every tap (dy, dx) becomes lane shift dy*Wp+dx --
    tap_offs = [dy * Wp + dx for dy in range(ks) for dx in range(ks)]
    max_off = tap_offs[-1]
    q_needed = (H - 1) * Wp + W           # max valid flattened output index + 1
    x_bytes = jnp.dtype(compute_dtype).itemsize

    q_tile, fp = _pick_q_tile(q_needed, max_off, Cin, cout_tot, kkc_pad,
                              x_bytes, B)
    n_q = _ceil_div(q_needed, q_tile)
    x_len = (n_q + 1) * q_tile            # +1 tile so the "t+1" BlockSpec is valid

    x_pad = jnp.pad(x, ((0, 0), (0, 0), (pad, pad), (pad, pad)))
    x_flat = x_pad.reshape(B, Cin, Hp * Wp)
    x_flat = jnp.pad(x_flat, ((0, 0), (0, 0), (0, x_len - Hp * Wp)))
    x_flat = x_flat.astype(compute_dtype)

    kernel = _make_conv_kernel(tap_offs, q_tile, kkc_pad - kkc, has_bias)

    # Resident operands (constant index maps — fetched once by the pipeline).
    in_specs = [pl.BlockSpec((cout_tot, kkc_pad), lambda b, t: (0, 0))]
    operands = [w2d]
    if has_bias:
        in_specs.append(pl.BlockSpec((cout_tot, 1), lambda b, t: (0, 0)))
        operands.append(b2d)
    # x window: tiles t and t+1 of the flattened padded image (halo via overlap).
    in_specs += [
        pl.BlockSpec((pl.Squeezed(), Cin, q_tile), lambda b, t: (b, 0, t)),
        pl.BlockSpec((pl.Squeezed(), Cin, q_tile), lambda b, t: (b, 0, t + 1)),
    ]
    operands += [x_flat, x_flat]

    vmem_limit = int(min(44 * 2**20, max(32 * 2**20, 2 * fp + 8 * 2**20)))

    out_flat = pl.pallas_call(
        kernel,
        out_shape=jax.ShapeDtypeStruct((B, cout_tot, n_q * q_tile), jnp.float32),
        grid=(B, n_q),
        in_specs=in_specs,
        out_specs=pl.BlockSpec((pl.Squeezed(), cout_tot, q_tile),
                               lambda b, t: (b, 0, t)),
        compiler_params=pltpu.CompilerParams(
            dimension_semantics=("parallel", "parallel"),
            vmem_limit_bytes=vmem_limit),
    )(*operands)

    # Valid output pixel (i, j) sits at flattened-padded index q = i*Wp + j;
    # strip the padded-grid garbage with cheap XLA reshapes/slices.
    need = Hp * Wp
    if out_flat.shape[-1] < need:
        out_flat = jnp.pad(out_flat,
                           ((0, 0), (0, 0), (0, need - out_flat.shape[-1])))
    out = out_flat[:, :, :need].reshape(B, cout_tot, Hp, Wp)[:, :, :H, :W]
    return out


# ----------------------------------------------------------------------------
# Pure-JAX reference (mirrors the PyTorch module exactly) for validation
# ----------------------------------------------------------------------------
def reference_forward(x, s_bases, rot_mtx_s, joint_coeff, bias,
                      kernel_size, Ntheta):
    K, Cout, Cin = joint_coeff.shape
    ks = kernel_size
    pad = (ks - 1) // 2
    bases = s_bases.reshape(-1, K)
    coeff = joint_coeff.reshape(K, -1)
    kernels = []
    for i in range(Ntheta):
        k_i = bases @ (rot_mtx_s[i].T @ coeff)
        kernels.append(k_i.reshape(ks, ks, Cout, Cin))
    rk = jnp.stack(kernels, axis=2)                 # (ks, ks, Ntheta, Co, Ci)
    rk = rk.reshape(ks, ks, Ntheta * Cout, Cin)
    rk = jnp.transpose(rk, (2, 3, 0, 1))            # OIHW
    out = lax.conv_general_dilated(
        x, rk, window_strides=(1, 1),
        padding=[(pad, pad), (pad, pad)],
        dimension_numbers=("NCHW", "OIHW", "NCHW"))
    if bias is not None:
        out = out + jnp.tile(bias, Ntheta).reshape(1, -1, 1, 1)
    return out


if __name__ == "__main__":
    # Module hyper-parameters (small, consistent with the PyTorch __init__).
    out_channels, in_channels, kernel_size = 4, 4, 3
    Ntheta, K, K_a = 4, 5, 3
    B, H, W = 2, 16, 16

    key = jax.random.PRNGKey(0)
    k1, k2, k3, k4, k5 = jax.random.split(key, 5)

    # Deterministic synthetic stand-ins for initialize_bases('FB_FOUR', ...).
    s_bases = jax.random.normal(k1, (kernel_size, kernel_size, K), jnp.float32)
    rot_mtx_s = jax.random.normal(k2, (Ntheta, K, K), jnp.float32) / K

    stdv = 1.0 / math.sqrt(K * in_channels)
    joint_coeff = stdv * jax.random.normal(
        k3, (K, out_channels, in_channels), jnp.float32)
    bias = (1.0 / math.sqrt(out_channels)) * jax.random.normal(
        k4, (out_channels,), jnp.float32)

    x = jax.random.normal(k5, (B, in_channels, H, W), jnp.float32)

    ref = reference_forward(x, s_bases, rot_mtx_s, joint_coeff, bias,
                            kernel_size, Ntheta)
    ref = np.asarray(jax.block_until_ready(ref))

    # f32 operand path (tight check).
    out_f32 = rot_dcf_forward(x, s_bases, rot_mtx_s, joint_coeff, bias,
                              kernel_size, Ntheta, compute_dtype=jnp.float32)
    out_f32 = jax.block_until_ready(out_f32)
    assert out_f32.shape == (B, Ntheta * out_channels, H, W), out_f32.shape
    np.testing.assert_allclose(np.asarray(out_f32), ref, atol=1e-4, rtol=1e-4)

    # bf16 operand path (production dtype on v6e/v7x; f32 MXU accumulation).
    out_bf16 = rot_dcf_forward(x, s_bases, rot_mtx_s, joint_coeff, bias,
                               kernel_size, Ntheta, compute_dtype=jnp.bfloat16)
    out_bf16 = jax.block_until_ready(out_bf16)
    np.testing.assert_allclose(np.asarray(out_bf16), ref, atol=1e-1, rtol=1e-1)

    # bias=None path (skips the bias operand entirely).
    out_nb = rot_dcf_forward(x, s_bases, rot_mtx_s, joint_coeff, None,
                             kernel_size, Ntheta)
    out_nb = jax.block_until_ready(out_nb)
    ref_nb = reference_forward(x, s_bases, rot_mtx_s, joint_coeff, None,
                               kernel_size, Ntheta)
    np.testing.assert_allclose(np.asarray(out_nb), np.asarray(ref_nb),
                               atol=1e-4, rtol=1e-4)

    print("KERNEL_OK")
</pallas_src>

<mosaic_0001>
module attributes {stable_mosaic.version = 11 : i64} {
  func.func @kernel(%arg0: i32, %arg1: i32, %arg2: memref<16x40xf32, #tpu.memory_space<vmem>>, %arg3: memref<16x1xf32, #tpu.memory_space<vmem>>, %arg4: memref<1x4x384xf32, #tpu.memory_space<vmem>>, %arg5: memref<1x4x384xf32, #tpu.memory_space<vmem>>, %arg6: memref<1x16x384xf32, #tpu.memory_space<vmem>>) attributes {dimension_semantics = [#tpu.dimension_semantics<parallel>, #tpu.dimension_semantics<parallel>], iteration_bounds = array<i64: 2, 1>, scalar_prefetch = 0 : i64, scratch_operands = 0 : i64, tpu.core_type = #tpu.core_type<tc>, window_params = [{pipeline_mode = #tpu.pipeline_mode<synchronous>, transform_indices = @transform_0, window_bounds = array<i64: 16, 40>}, {pipeline_mode = #tpu.pipeline_mode<synchronous>, transform_indices = @transform_1, window_bounds = array<i64: 16, 1>}, {transform_indices = @transform_2, window_bounds = array<i64: 1, 4, 384>}, {transform_indices = @transform_3, window_bounds = array<i64: 1, 4, 384>}, {transform_indices = @transform_4, window_bounds = array<i64: 1, 16, 384>}]} {
    %c0 = arith.constant 0 : index
    %c0_0 = arith.constant 0 : index
    %c0_1 = arith.constant 0 : index
    %0 = vector.load %arg4[%c0, %c0_0, %c0_1] : memref<1x4x384xf32, #tpu.memory_space<vmem>>, vector<1x4x384xf32>
    %1 = vector.shape_cast %0 : vector<1x4x384xf32> to vector<4x384xf32>
    %c0_2 = arith.constant 0 : index
    %c0_3 = arith.constant 0 : index
    %c0_4 = arith.constant 0 : index
    %2 = vector.load %arg5[%c0_2, %c0_3, %c0_4] : memref<1x4x384xf32, #tpu.memory_space<vmem>>, vector<1x4x384xf32>
    %3 = vector.shape_cast %2 : vector<1x4x384xf32> to vector<4x384xf32>
    %4 = tpu.concatenate %1, %3 in 1 : vector<4x384xf32>, vector<4x384xf32> -> vector<4x768xf32>
    %5 = vector.extract_strided_slice %4 {offsets = [0, 0], sizes = [4, 384], strides = [1, 1]} : vector<4x768xf32> to vector<4x384xf32>
    %6 = vector.extract_strided_slice %4 {offsets = [0, 1], sizes = [4, 384], strides = [1, 1]} : vector<4x768xf32> to vector<4x384xf32>
    %7 = vector.extract_strided_slice %4 {offsets = [0, 2], sizes = [4, 384], strides = [1, 1]} : vector<4x768xf32> to vector<4x384xf32>
    %8 = vector.extract_strided_slice %4 {offsets = [0, 18], sizes = [4, 384], strides = [1, 1]} : vector<4x768xf32> to vector<4x384xf32>
    %9 = vector.extract_strided_slice %4 {offsets = [0, 19], sizes = [4, 384], strides = [1, 1]} : vector<4x768xf32> to vector<4x384xf32>
    %10 = vector.extract_strided_slice %4 {offsets = [0, 20], sizes = [4, 384], strides = [1, 1]} : vector<4x768xf32> to vector<4x384xf32>
    %11 = vector.extract_strided_slice %4 {offsets = [0, 36], sizes = [4, 384], strides = [1, 1]} : vector<4x768xf32> to vector<4x384xf32>
    %12 = vector.extract_strided_slice %4 {offsets = [0, 37], sizes = [4, 384], strides = [1, 1]} : vector<4x768xf32> to vector<4x384xf32>
    %13 = vector.extract_strided_slice %4 {offsets = [0, 38], sizes = [4, 384], strides = [1, 1]} : vector<4x768xf32> to vector<4x384xf32>
    %cst = arith.constant 0.000000e+00 : f32
    %14 = vector.broadcast %cst : f32 to vector<4x384xf32>
    %15 = tpu.concatenate %5, %6, %7, %8, %9, %10, %11, %12, %13, %14 in 0 : vector<4x384xf32>, vector<4x384xf32>, vector<4x384xf32>, vector<4x384xf32>, vector<4x384xf32>, vector<4x384xf32>, vector<4x384xf32>, vector<4x384xf32>, vector<4x384xf32>, vector<4x384xf32> -> vector<40x384xf32>
    %c0_5 = arith.constant 0 : index
    %c0_6 = arith.constant 0 : index
    %16 = vector.load %arg2[%c0_5, %c0_6] : memref<16x40xf32, #tpu.memory_space<vmem>>, vector<16x40xf32>
    %cst_7 = arith.constant dense<0.000000e+00> : vector<16x384xf32>
    %17 = tpu.matmul %16, %15, %cst_7 {dimension_numbers = #tpu.dot_dimension_numbers<[1], [0], [0], [1], [0, 0, 1, 1], [], []>} : vector<16x40xf32>, vector<40x384xf32>, vector<16x384xf32> -> vector<16x384xf32>
    %c0_8 = arith.constant 0 : index
    %c0_9 = arith.constant 0 : index
    %18 = vector.load %arg3[%c0_8, %c0_9] : memref<16x1xf32, #tpu.memory_space<vmem>>, vector<16x1xf32>
    %19 = vector.broadcast %18 : vector<16x1xf32> to vector<16x384xf32>
    %20 = arith.addf %17, %19 : vector<16x384xf32>
    %c0_10 = arith.constant 0 : index
    %c0_11 = arith.constant 0 : index
    %c0_12 = arith.constant 0 : index
    %21 = vector.load %arg6[%c0_10, %c0_11, %c0_12] : memref<1x16x384xf32, #tpu.memory_space<vmem>>, vector<1x16x384xf32>
    %22 = vector.shape_cast %21 : vector<1x16x384xf32> to vector<16x384xf32>
    %23 = vector.shape_cast %20 : vector<16x384xf32> to vector<1x16x384xf32>
    tpu.vector_store %arg6[%c0_10, %c0_11, %c0_12], %23 {strides = array<i32>} : memref<1x16x384xf32, #tpu.memory_space<vmem>>, vector<1x16x384xf32>,
    return
  }
  func.func @transform_0(%arg0: i32, %arg1: i32) -> (i32, i32) {
    %c0_i32 = arith.constant 0 : i32
    %c0_i32_0 = arith.constant 0 : i32
    %c0_i32_1 = arith.constant 0 : i32
    return %c0_i32, %c0_i32_0 : i32, i32
  }
  func.func @transform_1(%arg0: i32, %arg1: i32) -> (i32, i32) {
    %c0_i32 = arith.constant 0 : i32
    %c0_i32_0 = arith.constant 0 : i32
    %c0_i32_1 = arith.constant 0 : i32
    return %c0_i32, %c0_i32_0 : i32, i32
  }
  func.func @transform_2(%arg0: i32, %arg1: i32) -> (i32, i32, i32) {
    %c0_i32 = arith.constant 0 : i32
    %c0_i32_0 = arith.constant 0 : i32
    return %arg0, %c0_i32, %arg1 : i32, i32, i32
  }
  func.func @transform_3(%arg0: i32, %arg1: i32) -> (i32, i32, i32) {
    %c1_i32 = arith.constant 1 : i32
    %0 = arith.addi %arg1, %c1_i32 : i32
    %c0_i32 = arith.constant 0 : i32
    %c0_i32_0 = arith.constant 0 : i32
    return %arg0, %c0_i32, %0 : i32, i32, i32
  }
  func.func @transform_4(%arg0: i32, %arg1: i32) -> (i32, i32, i32) {
    %c0_i32 = arith.constant 0 : i32
    %c0_i32_0 = arith.constant 0 : i32
    return %arg0, %c0_i32, %arg1 : i32, i32, i32
  }
}

</mosaic_0001>

<bundles_post_ra>
// kernel: tpu_custom_call.1
= control target key start
LH: loop header
LB: loop body
LE: loop exit
PB: predicated region body
PF: predicated region fallthrough
CT: control target
= control target key end

     0   :  { %9 = vsyncpa [#allocation3], 0  ;;  %s1440_s0 = inlined_call_operand.vmem [shape: f32[16,40], index: 0, kind: input, shape index: {}]   ;;  %s1441_s1 = inlined_call_operand.vmem [shape: f32[16,1], index: 1, kind: input, shape index: {}]   ;;  %s1442_s2 = inlined_call_operand.hbm [shape: f32[2,4,768], index: 2, kind: input, shape index: {}]   ;;  %s1443_s3 = inlined_call_operand.hbm [shape: f32[2,4,768], index: 3, kind: input, shape index: {}]   ;;  %s1444_s4 = inlined_call_operand.hbm [shape: f32[2,16,384], index: 4, kind: output, shape index: {}]  }
   0x1   :  { %11 = vsyncpa [#allocation3 + $0x1], 0 }
   0x2   :  { %12 = vsyncpa [#allocation6], 0 }
   0x3   :  { %14 = vsyncpa [#allocation6 + $0x1], 0 }
   0x4   :  { %15 = vsyncpa [#allocation4], 0 }
   0x5   :  { %17 = vsyncpa [#allocation4 + $0x1], 0  ;;  %s1138_s15 = smov 0   ;;  %s1140_s16 = smov 0  }
   0x6   :  { %s1142_s17 = smov 0   ;;  %s1144_s18 = smov 0  }
   0x7   :  { %s1146_s19 = smov 0   ;;  %s1148_s20 = smov 0  }
   0x8 LB: > { %s738_s21 = sadd.s32 4294967295, %s1096_s20   ;;  %s739_s22 = sadd.s32 4294967294, %s1096_s20   ;;  %s1096_s20 = sphi %s1148_s20, %s23_s20   ;;  %s1092_s19 = sphi %s1146_s19, %s1463_s19   ;;  %s1088_s18 = sphi %s1144_s18, %s1462_s18   ;;  %s1084_s17 = sphi %s1142_s17, %s1461_s17   ;;  %s1080_s16 = sphi %s1140_s16, %s1460_s16   ;;  %s1076_s15 = sphi %s1138_s15, %s1459_s15  }
   0x9   : > { %s35_s23 = sadd.s32 1, %s1092_s19  ;;  %s86_s24 = sadd.s32 1, %s1084_s17 }
   0xa   : > { %p37_p0 = scmp.ge.s32.totalorder %s35_s23, 2  ;;  %p93_p1 = scmp.ne.s32.totalorder %s1084_s17, %s1080_s16 }
   0xb   : > { %p94_p2 = scmp.eq.s32.totalorder %s1096_s20, 0  ;;  %p99_p3 = scmp.ne.s32.totalorder %s1080_s16, %s1076_s15 }
   0xc   : > { %s1465_s23 = smov (%p37_p0, %s35_s23), 0  ;;  %p100_p5 = scmp.eq.s32.totalorder %s738_s21, 0 }
   0xd   : > { %p1179_p4 = por %p94_p2, %p93_p1  ;;  %s81_s26 = ssub.s32 %s1092_s19, %s1465_s23 }
   0xe   : > { %p155_p6 = scmp.eq.s32.totalorder %s738_s21, 1  ;;  %p84_p7 = scmp.eq.s32.totalorder %s81_s26, 0 }
   0xf   : > { %p1185_p8 = por %p100_p5, %p99_p3  ;;  %p161_p10 = scmp.eq.s32.totalorder %s739_s22, 1 }
  0x10   : > { %p1189_p9 = por %p155_p6, %p93_p1  ;;  %p814_p13 = scmp.lt.s32.totalorder %s1096_s20, 2 }
  0x11   : > { %s1448_s27 = scalar_select %p1185_p8, 1, 0 }
  0x12   : > { %s1449_s28 = scalar_select %p1189_p9, 1, 0 }
  0x13   : > { %s1194_s29 = scalar_select %p84_p7, %s1084_s17, %s86_s24  }
  0x14   : > { %p1196_p11 = por %p161_p10, %p99_p3  ;;  %s1203_s5 = sand.u32 1, %s1084_s17  }
  0x15   : > { %s791_s6 = smul.u32 12, %s1203_s5  ;;  %p1209_p0 = pnand %p814_p13, %p1179_p4 }
  0x16   : > { %s1450_s30 = scalar_select %p1196_p11, 1, 0 }
  0x17   : > { %s792_s7 = smul.u32 384, %s1092_s19  ;;  %s191_s12 = scalar_lea.vmem [#allocation2], %s791_s6 }
  0x18   : > { %s201_s13 = sshll.u32 %s191_s12, 4  ;;  %s188_s14 = scalar_lea.sflag [#allocation3], %s1203_s5  ;;  %s1223_s13 = int_to_ptr.vmem [resolvable:$true] %s201_s13 }
  0x19   : > { %s1219_s11 = scalar_lea.hbm %s1442_s2, %s792_s7  ;;  %p951_p3 = pneg %p1209_p0 }
  0x1a   : > { %s949_s21 = scalar_lea.hbm %s1219_s11, 192  ;;  %s954_s25 = scalar_lea.hbm %s1442_s2, 768 }
  0x1b   : > { %p950_p2 = scmp.ne.s32.totalorder %s1219_s11, %s949_s21  ;;  %p955_p6 = scmp.lt.u32.totalorder %s1219_s11, %s1442_s2 }
  0x1c   : > { %p956_p7 = scmp.lt.u32.totalorder %s954_s25, %s949_s21  ;;  %p958_p13 = scmp.lt.u32.totalorder %s949_s21, %s1219_s11 }
  0x1d   : > { %p952_p4 = pnand %p951_p3, %p950_p2 }
  0x1e   : > { %p957_p10 = por %p956_p7, %p955_p6 }
  0x1f   : > { %p953_p5 = pneg %p952_p4 }
  0x20   : > { %p959_p12 = por %p958_p13, %p957_p10 }
  0x22   : > { %p960_p1 = pnand %p959_p12, %p953_p5 }
  0x24   : > { %963 = shalt.err (!%p960_p1)
}
  0x25   : > { %s964_s10 = scalar_lea.vmem %s1223_s13, 192  ;;  %s1098_s12 = smov [#allocation2]  }
  0x26   : > { %p965_p2 = scmp.ne.s32.totalorder %s1223_s13, %s964_s10  ;;  %s969_s22 = sshll.u32 %s1098_s12, 4  ;;  %s970_s22 = int_to_ptr.vmem [resolvable:$false] %s969_s22 }
  0x27   : > { %s971_s24 = scalar_lea.vmem %s970_s22, 384  ;;  %p972_p9 = scmp.lt.s32.totalorder %s1223_s13, %s970_s22 }
  0x28   : > { %p967_p4 = pnand %p965_p2, %p951_p3  ;;  %p973_p6 = scmp.lt.s32.totalorder %s971_s24, %s964_s10 }
  0x2a   : > { %p968_p11 = pneg %p967_p4  ;;  %p974_p7 = por %p973_p6, %p972_p9 }
  0x2c   : > { %p975_p10 = pnand %p974_p7, %p968_p11 }
  0x2e   : > { %978 = shalt.err (!%p975_p10)
}
  0x2f   : > { %806 = dma.hbm_to_vmem [thread:$0]  (!%p1209_p0), %s1219_s11, 192, %s1223_s13, %s188_s14  }
  0x30   : > { %p228_p12 = scmp.lt.s32.totalorder %s1096_s20, 3  ;;  %s669_s26 = scalar_lea.hbm %s1443_s3, %s792_s7 }
  0x31   : > { %p1452_p9 = scmp.ge.s32.totalorder %s1096_s20, 1  ;;  %s1263_s10 = scalar_lea.hbm %s669_s26, 192 }
  0x32   : > { %s212_s12 = scalar_lea.vmem [#allocation5], %s791_s6  ;;  %s209_s11 = scalar_lea.sflag [#allocation6], %s1203_s5 }
  0x33   : > { %p1259_p11 = pnand %p1452_p9, %p228_p12  ;;  %s223_s22 = sshll.u32 %s212_s12, 4  ;;  %s224_s22 = int_to_ptr.vmem [resolvable:$true] %s223_s22 }
  0x34   : > { %s1009_s13 = scalar_lea.hbm %s669_s26, 384  ;;  %s984_s24 = scalar_lea.hbm %s1443_s3, 768 }
  0x35   : > { %s1453_s9 = scalar_select %p1259_p11, 1, 0 }
  0x36   : > { %p980_p1 = scmp.ne.s32.totalorder %s1263_s10, %s1009_s13  ;;  %p985_p2 = scmp.lt.u32.totalorder %s1263_s10, %s1443_s3 }
  0x37   : > { %p986_p4 = scmp.lt.u32.totalorder %s984_s24, %s1009_s13  ;;  %p988_p7 = scmp.lt.u32.totalorder %s1009_s13, %s1263_s10 }
  0x38   : > { %p982_p5 = pnand %p980_p1, %p951_p3 }
  0x39   : > { %p987_p6 = por %p986_p4, %p985_p2 }
  0x3a   : > { %p983_p13 = pneg %p982_p5 }
  0x3b   : > { %p989_p10 = por %p988_p7, %p987_p6 }
  0x3d   : > { %p990_p12 = pnand %p989_p10, %p983_p13 }
  0x3f   : > { %993 = shalt.err (!%p990_p12)
}
  0x40   : > { %s994_s5 = scalar_lea.vmem %s224_s22, 192  ;;  %s1099_s6 = smov [#allocation5]  }
  0x41   : > { %p995_p9 = scmp.ne.s32.totalorder %s224_s22, %s994_s5  ;;  %s999_s26 = sshll.u32 %s1099_s6, 4  ;;  %s1000_s26 = int_to_ptr.vmem [resolvable:$false] %s999_s26 }
  0x42   : > { %s1001_s12 = scalar_lea.vmem %s1000_s26, 384  ;;  %p1002_p8 = scmp.lt.s32.totalorder %s224_s22, %s1000_s26 }
  0x43   : > { %p997_p1 = pnand %p995_p9, %p951_p3  ;;  %p1003_p11 = scmp.lt.s32.totalorder %s1001_s12, %s994_s5 }
  0x45   : > { %p998_p5 = pneg %p997_p1  ;;  %p1004_p2 = por %p1003_p11, %p1002_p8 }
  0x47   : > { %p1005_p4 = pnand %p1004_p2, %p998_p5 }
  0x49   : > { %1008 = shalt.err (!%p1005_p4)
}
  0x4a   : > { %809 = dma.hbm_to_vmem [thread:$0]  (!%p1209_p0), %s1263_s10, 192, %s224_s22, %s209_s11  }
  0x4b   : > { %p1454_p13 = scmp.ne.s32.totalorder %s1453_s9, 0 }
  0x4c   : > { %s1289_s13 = sand.u32 (!%p1454_p13), 1, %s1080_s16   ;;  %p1455_p3 = scmp.ne.s32.totalorder (!%p1454_p13), %s1448_s27, 0 }
  0x4d   : > { %232 = sbr.rel (%p1454_p13) target bundleno = 477 (0x1dd), region = 36  ;;  %s235_s14 = scalar_lea.sflag (!%p1454_p13), [#allocation3], %s1289_s13 }
  0x4e   : > { %s794_s7 = smul.u32 (!%p1454_p13), 12, %s1289_s13 }
  0x50   : > { %s238_s24 = scalar_lea.vmem (!%p1454_p13), [#allocation2], %s794_s7 }
  0x54   : > { %1063 = dma.done.wait (%p1455_p3), %s235_s14, 192  }
  0x55   : > { %1065 = vsyncadd (%p1455_p3), %s235_s14, 4294967104  ;;  %s244_s8 = scalar_lea.sflag [#allocation6], %s1289_s13  ;;  %s247_s10 = scalar_lea.vmem [#allocation5], %s794_s7 }
  0x56   : > { %1067 = dma.done.wait (%p1455_p3), %s244_s8, 192  }
  0x57   : > { %1069 = vsyncadd (%p1455_p3), %s244_s8, 4294967104  ;;  %v1302_v0 = vld [vmem:[%s238_s24] sm:$0xff]  ;;  %v283_v1 = vld [vmem:[%s247_s10] sm:$0xff]  ;;  %s1100_s9 = smov 126   ;;  %s1101_s27 = smov 110   ;;  %v1107_v11 = vmov 0.0  }
  0x58   : > { %v1304_v2 = vld [vmem:[%s238_s24 + $0x8] sm:$0xf]  ;;  %v876_v3 = vpack.i.bf16 %v283_v1, %v1302_v0  ;;  %v1309_v4 = vcombine.high %v1302_v0, %v1302_v0  ;;  %v289_v6 = vrot.slane %v1302_v0, 4  ;;  %v292_v7 = vrot.slane %v283_v1, 4  ;;  %s1102_s22 = smov 127   ;;  %s1103_s11 = smov 109   ;;  %514 = vmatprep.mubr.f32.mxu0 %v1107_v11 }
  0x59   : > { %v291_v5 = vrot.slane %v1304_v2, 4  ;;  %s1104_s21 = smov 108   ;;  %s1105_s25 = smov 92   ;;  %v1320_v12 = vld [vmem:[%s1440_s0] sm:$0xff]  ;;  %vm443_vm0 = vcmask 326656   ;;  %v1109_v13 = vmov 0  }
  0x5a   : > { %877 = vrot.lane.b32.xlu0 %v876_v3, %s1100_s9  ;;  %v896_v9 = vpack.i.bf16 %v292_v7, %v289_v6  ;;  %v886_v10 = vpack.i.bf16 %v1304_v2, %v1309_v4  ;;  %s1106_s5 = smov 91   ;;  %772 = vmatprep.mubr.msk.f32.mxu1 %vm443_vm0, %v1320_v12  ;;  %s1108_s12 = smov 90   ;;  %v431_v14 = vld [vmem:[%s1441_s1] sm:$0xff]  ;;  %v432_v15 = vld [vmem:[%s1441_s1 + $0x8] sm:$0xff]  ;;  %vm301_vm1 = vcmask 1039360   ;;  %vm331_vm2 = vcmask 900096  }
  0x5b   : > { %v891_v8 = vpack.i.bf16 %v291_v5, %v1309_v4  ;;  %946 = vset.pattern.permute.xlu0 %v1109_v13  ;;  %947 = vset.pattern.permute.xlu1 %v1109_v13  ;;  %vm316_vm3 = vcmask 1031168   ;;  %vm413_vm4 = vcmask 1043456   ;;  %vm346_vm5 = vcmask 891904   ;;  %p1456_p0 = scmp.ne.s32.totalorder %s1449_s28, 0 }
  0x5c   : > { %vm376_vm6 = vcmask 752640   ;;  %vm361_vm7 = vcmask 883712   ;;  %vm391_vm8 = vcmask 744448   ;;  %vm406_vm9 = vcmask 736256  }
  0x5d   : > { %892 = vrot.lane.b32.xlu1 %v891_v8, %s1101_s27 }
  0x5e   : > { %882 = vrot.lane.b32.xlu0 %v891_v8, %s1102_s22 }
  0x61   : > { %897 = vrot.lane.b32.xlu1 %v896_v9, %s1102_s22 }
  0x62   : > { %887 = vrot.lane.b32.xlu0 %v886_v10, %s1100_s9 }
  0x65   : > { %902 = vrot.lane.b32.xlu1 %v896_v9, %s1101_s27  ;;  %s795_s27 = smul.u32 48, %s1289_s13 }
  0x66   : > { %907 = vrot.lane.b32.xlu0 %v886_v10, %s1103_s11 }
  0x67   : > { %s276_s22 = scalar_lea.vmem [#allocation7], %s795_s27 }
  0x69   : > { %912 = vrot.lane.b32.xlu1 %v891_v8, %s1104_s21 }
  0x6a   : > { %917 = vrot.lane.b32.xlu0 %v886_v10, %s1105_s25 }
  0x6d   : > { %922 = vrot.lane.b32.xlu1 %v891_v8, %s1106_s5 }
  0x6e   : > { %927 = vrot.lane.b32.xlu0 %v876_v3, %s1103_s11  ;;  %s624_s11 = sshll.u32 %s276_s22, 4  ;;  %s1386_s11 = int_to_ptr.vmem [resolvable:$true] %s624_s11 }
  0x6f   : > { %s1010_s26 = scalar_lea.vmem %s1386_s11, 768 }
  0x70   : > { %p1011_p8 = scmp.ne.s32.totalorder %s1386_s11, %s1010_s26 }
  0x71   : > { %932 = vrot.lane.b32.xlu1 %v896_v9, %s1104_s21  ;;  %s796_s21 = smul.u32 768, %s1088_s18  ;;  %s609_s18 = scalar_lea.sflag [#allocation4], %s1289_s13 }
  0x72   : > { %937 = vrot.lane.b32.xlu0 %v876_v3, %s1105_s25  ;;  %p1012_p11 = pnand %p1011_p8, %p1456_p0 }
  0x73   : > { %s1391_s6 = scalar_lea.hbm %s1444_s4, %s796_s21 }
  0x74   : > { %p1013_p6 = pneg %p1012_p11 }
  0x75   : > { %942 = vrot.lane.b32.xlu1 %v896_v9, %s1106_s5 }
  0x76   : > { %400 = vrot.lane.b32.xlu0 %v1309_v4, %s1108_s12 }
  0x79   : > { %402 = vrot.lane.b32.xlu1 %v1304_v2, %s1108_s12 }
  0x7a   : > { %398 = vrot.lane.b32.xlu0 %v1302_v0, %s1108_s12 }
  0x7d   : > { %404 = vrot.lane.b32.xlu1 %v283_v1, %s1108_s12  ;;  %s1110_s12 = smov [#allocation7]  }
  0x7e   : > { %435 = vperm.xlu0 %946, %v431_v14   ;;  %s1014_s7 = sshll.u32 %s1110_s12, 4  ;;  %s1015_s7 = int_to_ptr.vmem [resolvable:$false] %s1014_s7 }
  0x7f   : > { %s1016_s14 = scalar_lea.vmem %s1015_s7, 1536  ;;  %p1017_p7 = scmp.lt.s32.totalorder %s1386_s11, %s1015_s7 }
  0x80   : > { %p1018_p10 = scmp.lt.s32.totalorder %s1016_s14, %s1010_s26 }
  0x81   : > { %440 = vperm.xlu1 %947, %v432_v15  }
  0x82   : > { %p1019_p12 = por %p1018_p10, %p1017_p7 }
  0x84   : > { %p1020_p9 = pnand %p1019_p12, %p1013_p6 }
  0xcc   : > { %v878_v16 = vpop.permute.xlu0 %877 }
  0xcd   : > { %v879_v30 = vunpack.i.l.bf16 %v878_v16  ;;  %v880_v41 = vunpack.i.h.bf16 %v878_v16 }
  0xcf   : > { %v893_v17 = vpop.permute.xlu1 %892 }
  0xd0   : > { %v883_v18 = vpop.permute.xlu0 %882  ;;  %v895_v21 = vunpack.i.h.bf16 %v893_v17  ;;  %v894_v22 = vunpack.i.l.bf16 %v893_v17 }
  0xd1   : > { %v885_v19 = vunpack.i.h.bf16 %v883_v18  ;;  %v884_v20 = vunpack.i.l.bf16 %v883_v18 }
  0xd2   : > { %v333_v32 = vsel %vm331_vm2, %v894_v22, %v895_v21 }
  0xd3   : > { %v898_v23 = vpop.permute.xlu1 %897  ;;  %v303_v29 = vsel %vm301_vm1, %v884_v20, %v885_v19 }
  0xd4   : > { %v899_v24 = vunpack.i.l.bf16 %v898_v23  ;;  %v900_v25 = vunpack.i.h.bf16 %v898_v23  ;;  %v888_v26 = vpop.permute.xlu0 %887  ;;  %v415_v38 = vsel %vm413_vm4, %v1309_v4, %v303_v29 }
  0xd5   : > { %v890_v27 = vunpack.i.h.bf16 %v888_v26  ;;  %v889_v28 = vunpack.i.l.bf16 %v888_v26 }
  0xd6   : > { %v302_v36 = vsel %vm301_vm1, %v899_v24, %v884_v20  ;;  %v304_v40 = vsel %vm301_vm1, %v885_v19, %v900_v25 }
  0xd7   : > { %v903_v31 = vpop.permute.xlu1 %902  ;;  %v318_v35 = vsel %vm316_vm3, %v889_v28, %v890_v27  ;;  %v317_v43 = vsel %vm316_vm3, %v879_v30, %v889_v28  ;;  %v414_v46 = vsel %vm413_vm4, %v1302_v0, %v302_v36  ;;  %v319_v51 = vsel %vm316_vm3, %v890_v27, %v880_v41 }
  0xd8   : > { %v905_v33 = vunpack.i.h.bf16 %v903_v31  ;;  %v904_v34 = vunpack.i.l.bf16 %v903_v31  ;;  %v908_v37 = vpop.permute.xlu0 %907  ;;  %v418_v39 = vsel %vm413_vm4, %v318_v35, %v333_v32  ;;  %v416_v52 = vsel %vm413_vm4, %v1304_v2, %v304_v40 }
  0xd9   : > { %v775_v42 = vpack.c.bf16 %v418_v39, %v415_v38  ;;  %v910_v49 = vunpack.i.h.bf16 %v908_v37  ;;  %v909_v53 = vunpack.i.l.bf16 %v908_v37 }
  0xda   : > { %v332_v44 = vsel %vm331_vm2, %v904_v34, %v894_v22  ;;  %v334_v48 = vsel %vm331_vm2, %v895_v21, %v905_v33 }
  0xdb   : > { %v913_v45 = vpop.permute.xlu1 %912  ;;  %v417_v47 = vsel %vm413_vm4, %v317_v43, %v332_v44  ;;  %776 = vmatprep.subr.bf16.mxu0 %v775_v42  ;;  %v419_v57 = vsel %vm413_vm4, %v319_v51, %v334_v48  ;;  %v348_v1 = vsel %vm346_vm5, %v909_v53, %v910_v49  ;;  %v430_v42 = vld [vmem:[%s1440_s0 + $0x8] sm:$0xff] }
  0xdc   : > { %v777_v50 = vpack.c.bf16 %v417_v47, %v414_v46  ;;  %v915_v54 = vunpack.i.h.bf16 %v913_v45  ;;  %v914_v55 = vunpack.i.l.bf16 %v913_v45  ;;  %v918_v56 = vpop.permute.xlu0 %917  ;;  %v783_v60 = vpack.c.bf16 %v419_v57, %v416_v52 }
  0xdd   : > { %v920_v58 = vunpack.i.h.bf16 %v918_v56  ;;  %v919_v59 = vunpack.i.l.bf16 %v918_v56 }
  0xde   : > { %778 = vmatpush1.bf16.msra.mxu0 %v777_v50  ;;  %784 = vmatprep.subr.bf16.mxu1 %v783_v60  ;;  %v363_v2 = vsel %vm361_vm7, %v914_v55, %v915_v54 }
  0xdf   : > { %v923_v61 = vpop.permute.xlu1 %922  ;;  %v378_v62 = vsel %vm376_vm6, %v919_v59, %v920_v58  ;;  %786 = vmatpush3.bf16.msra.mxu1 %v783_v60  ;;  %v421_v9 = vsel %vm413_vm4, %v348_v1, %v363_v2 }
  0xe0   : > { %v925_v63 = vunpack.i.h.bf16 %v923_v61  ;;  %v924_v0 = vunpack.i.l.bf16 %v923_v61  ;;  %v928_v3 = vpop.permute.xlu0 %927 }
  0xe1   : > { %v930_v10 = vunpack.i.h.bf16 %v928_v3  ;;  %v929_v13 = vunpack.i.l.bf16 %v928_v3 }
  0xe2   : > { %v393_v4 = vsel %vm391_vm8, %v924_v0, %v925_v63 }
  0xe3   : > { %v933_v5 = vpop.permute.xlu1 %932  ;;  %v424_v6 = vsel %vm413_vm4, %v378_v62, %v393_v4  ;;  %v347_v23 = vsel %vm346_vm5, %v929_v13, %v909_v53  ;;  %v349_v24 = vsel %vm346_vm5, %v910_v49, %v930_v10 }
  0xe4   : > { %v935_v7 = vunpack.i.h.bf16 %v933_v5  ;;  %v934_v8 = vunpack.i.l.bf16 %v933_v5  ;;  %v938_v14 = vpop.permute.xlu0 %937  ;;  %v779_v15 = vpack.c.bf16 %v424_v6, %v421_v9 }
  0xe5   : > { %v940_v16 = vunpack.i.h.bf16 %v938_v14  ;;  %v939_v17 = vunpack.i.l.bf16 %v938_v14 }
  0xe6   : > { %780 = vmatprep.subr.bf16.mxu0 %v779_v15  ;;  %v362_v19 = vsel %vm361_vm7, %v934_v8, %v914_v55  ;;  %v364_v20 = vsel %vm361_vm7, %v915_v54, %v935_v7 }
  0xe7   : > { %v943_v18 = vpop.permute.xlu1 %942  ;;  %v377_v26 = vsel %vm376_vm6, %v939_v17, %v919_v59  ;;  %v379_v27 = vsel %vm376_vm6, %v920_v58, %v940_v16  ;;  %v420_v31 = vsel %vm413_vm4, %v347_v23, %v362_v19  ;;  %v422_v33 = vsel %vm413_vm4, %v349_v24, %v364_v20 }
  0xe8   : > { %v945_v21 = vunpack.i.h.bf16 %v943_v18  ;;  %v944_v22 = vunpack.i.l.bf16 %v943_v18  ;;  %v401_v25 = vpop.permute.xlu0 %400 }
  0xea   : > { %v392_v28 = vsel %vm391_vm8, %v944_v22, %v924_v0  ;;  %v394_v29 = vsel %vm391_vm8, %v925_v63, %v945_v21 }
  0xeb   : > { %v403_v30 = vpop.permute.xlu1 %402  ;;  %v423_v32 = vsel %vm413_vm4, %v377_v26, %v392_v28  ;;  %v425_v34 = vsel %vm413_vm4, %v379_v27, %v394_v29 }
  0xec   : > { %v408_v35 = vsel %vm406_vm9, %v401_v25, %v403_v30  ;;  %v781_v36 = vpack.c.bf16 %v423_v32, %v420_v31  ;;  %v787_v37 = vpack.c.bf16 %v425_v34, %v422_v33  ;;  %v399_v38 = vpop.permute.xlu0 %398 }
  0xed   : > { %v407_v41 = vsel %vm406_vm9, %v399_v38, %v401_v25 }
  0xee   : > { %782 = vmatpush1.bf16.msra.mxu0 %v781_v36  ;;  %788 = vmatprep.subr.bf16.mxu1 %v787_v37 }
  0xef   : > { %v405_v39 = vpop.permute.xlu1 %404  ;;  %745 = vmatprep.subr.msk.mxu0 %vm413_vm4, %v408_v35  ;;  %790 = vmatpush3.bf16.msra.mxu1 %v787_v37 }
  0xf0   : > { %v409_v40 = vsel %vm406_vm9, %v403_v30, %v405_v39 }
  0xf1   : > { %770 = vmatprep.subr.msk.mxu1 %vm413_vm4, %v409_v40 }
  0xf2   : > { %746 = vmatpush1.msk.msra.mxu0 %vm413_vm4, %v407_v41 }
  0xf3   : > { %747 = vmatmul.mubr.msk.f32.vlgmr.msra.gmra.mrb[0].mxu0 %vm443_vm0, %v1320_v12  ;;  %771 = vmatpush3.msk.msra.mxu1 %vm413_vm4, %v409_v40 }
  0xf4   : > { %520 = vmatprep.mubr.f32.mxu0 %v1107_v11  ;;  %773 = vmatmul.mubr.msk.f32.vlgmr.msra.gmra.mrb[0].mxu1 %vm443_vm0, %v430_v42 }
  0xf7   : > { %748 = vmatmul.mubr.msk.f32.gmra.mrb[2].mxu0 %vm443_vm0, %v430_v42 }
  0xfd   : > { %v436_v43 = vpop.permute.xlu0 %435 }
 0x100   : > { %v441_v44 = vpop.permute.xlu1 %440 }
 0x1c6   : > { %v516_v45 = vpop.f32.mrb[0].mxu0 }
 0x1c7   : > { %v517_v46 = vadd.f32 %v516_v45, %v436_v43  ;;  %v518_v47 = vpop.f32.mrb[1].mxu0  ;;  %v774_v48 = vpop.f32.mrb[0].mxu1 }
 0x1c8   : > { %v519_v49 = vadd.f32 %v518_v47, %v436_v43  ;;  %v599_v12 = vadd.f32 %v774_v48, %v441_v44  ;;  %v593_v50 = vpop.f32.mrb[1].mxu1 }
 0x1c9   : > { %602 = vst [vmem:[%s276_s22] sm:$0xff] %v517_v46  ;;  %v594_v11 = vadd.f32 %v593_v50, %v436_v43 }
 0x1ca   : > { %603 = vst [vmem:[%s276_s22 + $0x8] sm:$0xff] %v519_v49  ;;  %607 = vst [vmem:[%s276_s22 + $0x28] sm:$0xff] %v599_v12  ;;  %v522_v51 = vpop.f32.mrb[2].mxu0 }
 0x1cb   : > { %v523_v52 = vadd.f32 %v522_v51, %v441_v44  ;;  %604 = vst [vmem:[%s276_s22 + $0x10] sm:$0xff] %v594_v11  ;;  %v524_v53 = vpop.f32.mrb[3].mxu0 }
 0x1cc   : > { %v525_v54 = vadd.f32 %v524_v53, %v441_v44 }
 0x1cd   : > { %605 = vst [vmem:[%s276_s22 + $0x18] sm:$0xff] %v523_v52 }
 0x1ce   : > { %606 = vst [vmem:[%s276_s22 + $0x20] sm:$0xff] %v525_v54 }
 0x1cf   : > { %1023 = shalt.err (!%p1020_p9)
}
 0x1d0   : > { %s1024_s24 = scalar_lea.hbm %s1391_s6, 768  ;;  %s1028_s9 = scalar_lea.hbm %s1444_s4, 1536 }
 0x1d1   : > { %p1025_p1 = scmp.ne.s32.totalorder %s1391_s6, %s1024_s24  ;;  %p1029_p4 = scmp.lt.u32.totalorder %s1391_s6, %s1444_s4 }
 0x1d2   : > { %p1030_p13 = scmp.lt.u32.totalorder %s1028_s9, %s1024_s24  ;;  %p1032_p8 = scmp.lt.u32.totalorder %s1024_s24, %s1391_s6 }
 0x1d3   : > { %p1026_p5 = pnand %p1025_p1, %p1456_p0 }
 0x1d4   : > { %p1031_p3 = por %p1030_p13, %p1029_p4 }
 0x1d5   : > { %p1027_p2 = pneg %p1026_p5 }
 0x1d6   : > { %p1033_p11 = por %p1032_p8, %p1031_p3 }
 0x1d8   : > { %p1034_p6 = pnand %p1033_p11, %p1027_p2 }
 0x1da   : > { %1037 = shalt.err (!%p1034_p6)
}
 0x1db   : > { %s1111_s21 = smov 384   ;;  %s1112_s25 = smov 24  }
 0x1dc   : > { %801 = dma.vmem_to_hbm [thread:$0]  (%p1456_p0), %s1386_s11, 768, %s1391_s6, %s609_s18, %s1111_s21, %s1111_s21, %s1112_s25  }
 0x1dd PF: > { %s639_s5 = sand.u32 1, %s1076_s15   ;;  %p1457_p7 = scmp.ne.s32.totalorder %s1450_s30, 0 }
 0x1de   : > { %p1458_p10 = scmp.ge.s32.totalorder %s1096_s20, 2  ;;  %s640_s26 = scalar_lea.sflag [#allocation4], %s639_s5 }
 0x1e0   : > { %p811_p12 = pnand %p1458_p10, %p1457_p7 }
 0x1e2   : > { %1071 = dma.done.wait (!%p811_p12), %s640_s26, 768  }
 0x1e3   : > { %1073 = vsyncadd (!%p811_p12), %s640_s26, 4294966528  ;;  %s23_s20 = sadd.s32 1, %s1096_s20   ;;  %s1459_s15 = smov %s1080_s16 }
 0x1e4   : > { %p20_p9 = scmp.ge.s32.totalorder %s23_s20, 4   ;;  %s1460_s16 = smov %s1084_s17 }
 0x1e5   : > { %s1461_s17 = smov %s1194_s29  ;;  %s1462_s18 = smov %s1092_s19 }
 0x1e6   : > { %s1463_s19 = smov %s1465_s23  ;;  %22 = sbr.rel (!%p20_p9) target bundleno = 8 (0x8), region = 94 }
 0x1ed   :  { %645 = vsyncpa [#allocation3], 1 }
 0x1ee   :  { %647 = vsyncpa [#allocation3 + $0x1], 1 }
 0x1ef   :  { %648 = vsyncpa [#allocation6], 1 }
 0x1f0   :  { %650 = vsyncpa [#allocation6 + $0x1], 1 }
 0x1f1   :  { %651 = vsyncpa [#allocation4], 1 }
 0x1f2   :  { %653 = vsyncpa [#allocation4 + $0x1], 1 }

</bundles_post_ra>
